<compile_context>
chip_gen: v6e
topology: v6e:2x2x1
jax: 0.10.0
libtpu: 0.0.40
codegen_flags: <defaults>
</compile_context>

<pallas_src>
import functools

import jax
import jax.numpy as jnp
from jax.experimental import pallas as pl
from jax.experimental.pallas import tpu as pltpu


def _round_up(a, b):
    return (a + b - 1) // b * b


def _hybrid_kernel(x_ref, w_ref, tab_ref, out_ref, *,
                   kernel_size, stride, pad, c_in_p, lo_pad):
    """One (batch element, C_out tile) step, channels-first throughout.

    x_ref   : (stride*c_in_p, G)  bf16  phase-major rows: row p*c_in_p + ci
              holds x_padded[ci, g*stride + p] along the lane (group) axis.
    w_ref   : (K+1, tn_c, c_in_p) bf16  taps 0..K-1 = BN-scaled conv weights,
              tap K = 0.3 * residual 1x1 weights.
    tab_ref : (tn_c, 2)           f32   col 0 = BN shift (conv bias folded in),
              col 1 = 0.3 * residual bias.
    out_ref : (tn_c, lo_pad)      f32   channels-first output tile.
    """

    def tap(k):
        # Conv tap k == phase k % stride, group offset k // stride.
        p = k % stride
        g = k // stride
        return x_ref[pl.ds(p * c_in_p, c_in_p), pl.ds(g, lo_pad)]

    acc = jnp.dot(w_ref[0], tap(0), preferred_element_type=jnp.float32)
    for k in range(1, kernel_size):
        acc += jnp.dot(w_ref[k], tap(k), preferred_element_type=jnp.float32)

    # Main path: folded BN shift + tanh-GELU (EUP), 0.7 mix folded into 0.35.
    h = acc + tab_ref[:, 0:1]
    c0 = jnp.float32(0.7978845608028654)      # sqrt(2/pi)
    c1 = jnp.float32(0.044715)
    main = jnp.float32(0.35) * h * (1.0 + jnp.tanh(c0 * (h + c1 * h * h * h)))

    # Residual path: 1x1 conv on the strided input == the centre tap (k = pad).
    res = jnp.dot(w_ref[kernel_size], tap(pad),
                  preferred_element_type=jnp.float32)

    out_ref[...] = main + res + tab_ref[:, 1:2]


def hybrid_conv_block(x, params, *, kernel_size, stride, eps=1e-5):
    """Eval-mode HybridConvBlock forward. x: (N, C_in, L) f32 -> (N, C_out, L_out)."""
    w_main = params["w_main"]                      # (C_out, C_in, K)  PyTorch layout
    b_main = params["b_main"]                      # (C_out,)
    gamma, beta = params["gamma"], params["beta"]
    rmean, rvar = params["running_mean"], params["running_var"]

    N, c_in, L = x.shape
    c_out, _, K = w_main.shape
    assert K == kernel_size
    pad = K // 2
    L_out = (L + 2 * pad - K) // stride + 1

    # Residual branch: 1x1 conv, or nn.Identity when in_c == out_c.
    if params.get("w_res") is not None:
        w_res_mat = params["w_res"][:, :, 0]       # (C_out, C_in)
        b_res = params["b_res"]
    else:
        # nn.Identity ignores the stride, so it is only well defined here.
        assert c_in == c_out and stride == 1 and L_out == L, (
            "Identity residual requires in_c == out_c and stride == 1")
        w_res_mat = jnp.eye(c_out, dtype=jnp.float32)
        b_res = jnp.zeros((c_out,), jnp.float32)

    # ---- constant folding (wrapper-side, plain JAX) ----
    bn_scale = gamma / jnp.sqrt(rvar + eps)
    bn_shift = beta - rmean * bn_scale + b_main * bn_scale   # conv bias folded in

    # ---- padded sizes ----
    c_in_p = _round_up(c_in, 16)                   # bf16 sublane-aligned phase blocks
    lo_pad = _round_up(L_out, 128)                 # output lanes (L_out) -> 128-dense
    if c_out <= 512:
        c_out_pad = _round_up(c_out, 8)            # channels on sublanes: pad to 8 only
        tn_c = c_out_pad
    else:
        c_out_pad = _round_up(c_out, 128)
        tn_c = 128

    g_max = (K - 1) // stride
    G = max(g_max + lo_pad, pl.cdiv(L + 2 * pad, stride))
    total = G * stride

    # ---- stride-phase split ("space-to-depth") of the padded input ----
    # xs[n, p*c_in_p + ci, g] = x_padded[n, ci, g*stride + p]; single pass over
    # x, no K-fold im2col materialization, channels-first layout preserved.
    x_ext = jnp.pad(x, ((0, 0), (0, c_in_p - c_in), (pad, total - L - pad)))
    xs = x_ext.reshape(N, c_in_p, G, stride).transpose(0, 3, 1, 2)
    xs = xs.reshape(N, stride * c_in_p, G).astype(jnp.bfloat16)

    # ---- weights: taps 0..K-1 = BN-scaled main conv, tap K = 0.3 * residual ----
    w2 = jnp.zeros((K + 1, c_out_pad, c_in_p), jnp.float32)
    wm = jnp.transpose(w_main, (2, 0, 1)) * bn_scale[None, :, None]   # (K, C_out, C_in)
    w2 = w2.at[:K, :c_out, :c_in].set(wm)
    w2 = w2.at[K, :c_out, :c_in].set(0.3 * w_res_mat)
    w2 = w2.astype(jnp.bfloat16)

    tab = jnp.zeros((c_out_pad, 2), jnp.float32)
    tab = tab.at[:c_out, 0].set(bn_shift)
    tab = tab.at[:c_out, 1].set(0.3 * b_res)

    # ---- VMEM budget from padded tile shapes, generation-aware ----
    def tile_bytes(rows, cols, itemsize, sub):
        return _round_up(rows, sub) * _round_up(cols, 128) * itemsize

    est = 2 * (tile_bytes(stride * c_in_p, G, 2, 16)            # x block (bf16)
               + (K + 1) * tile_bytes(tn_c, c_in_p, 2, 16)      # weights (bf16)
               + tile_bytes(tn_c, 2, 4, 8)                      # shift/bias table
               + tile_bytes(tn_c, lo_pad, 4, 8))                # output block (f32)
    try:
        vmem_cap = int(pltpu.get_tpu_info().vmem_capacity_bytes)
    except Exception:                                            # pragma: no cover
        vmem_cap = 64 * 1024 * 1024                              # v7x per-core floor
    vmem_limit = int(min(max(32 * 1024 * 1024, 2 * est), 0.75 * vmem_cap))
    # TODO(synk): tile the L_out (lane) axis with a (K-1)//stride halo when
    # C_in * L is too large for a full-sequence-resident input block.

    grid = (N, c_out_pad // tn_c)
    kernel = functools.partial(_hybrid_kernel, kernel_size=K, stride=stride,
                               pad=pad, c_in_p=c_in_p, lo_pad=lo_pad)

    out = pl.pallas_call(
        kernel,
        out_shape=jax.ShapeDtypeStruct((N, c_out_pad, lo_pad), jnp.float32),
        grid=grid,
        in_specs=[
            pl.BlockSpec((None, stride * c_in_p, G), lambda n, j: (n, 0, 0)),
            pl.BlockSpec((K + 1, tn_c, c_in_p), lambda n, j: (0, j, 0)),
            pl.BlockSpec((tn_c, 2), lambda n, j: (j, 0)),
        ],
        out_specs=pl.BlockSpec((None, tn_c, lo_pad), lambda n, j: (n, j, 0)),
        compiler_params=pltpu.CompilerParams(
            dimension_semantics=("parallel", "parallel"),
            vmem_limit_bytes=vmem_limit),
    )(xs, w2, tab)

    # Output is already channels-first; just drop the padding.
    return out[:, :c_out, :L_out]


def _reference(x, params, *, kernel_size, stride, eps=1e-5):
    """Pure-JAX (XLA conv, full f32 precision, exact-erf GELU) eval-mode forward."""
    pad = kernel_size // 2
    dn = ("NCH", "OIH", "NCH")
    main = jax.lax.conv_general_dilated(
        x, params["w_main"], (stride,), [(pad, pad)], dimension_numbers=dn,
        precision=jax.lax.Precision.HIGHEST)
    main = main + params["b_main"][None, :, None]
    scale = params["gamma"] / jnp.sqrt(params["running_var"] + eps)
    shift = params["beta"] - params["running_mean"] * scale
    main = main * scale[None, :, None] + shift[None, :, None]
    main = 0.5 * main * (1.0 + jax.lax.erf(main * 0.7071067811865476))
    if params.get("w_res") is not None:
        res = jax.lax.conv_general_dilated(
            x, params["w_res"], (stride,), [(0, 0)], dimension_numbers=dn,
            precision=jax.lax.Precision.HIGHEST)
        res = res + params["b_res"][None, :, None]
    else:
        res = x
    return main * 0.7 + res * 0.3


if __name__ == "__main__":
    # Small shapes consistent with the module: Conv1d input (N, C_in, L).
    N, C_IN, C_OUT, L, KSIZE = 2, 4, 8, 16, 3

    key = jax.random.PRNGKey(0)
    keys = jax.random.split(key, 10)
    params = {
        "w_main": 0.2 * jax.random.normal(keys[0], (C_OUT, C_IN, KSIZE), jnp.float32),
        "b_main": 0.1 * jax.random.normal(keys[1], (C_OUT,), jnp.float32),
        "w_res":  0.2 * jax.random.normal(keys[2], (C_OUT, C_IN, 1), jnp.float32),
        "b_res":  0.1 * jax.random.normal(keys[3], (C_OUT,), jnp.float32),
        "gamma":  1.0 + 0.1 * jax.random.normal(keys[4], (C_OUT,), jnp.float32),
        "beta":   0.1 * jax.random.normal(keys[5], (C_OUT,), jnp.float32),
        "running_mean": 0.1 * jax.random.normal(keys[6], (C_OUT,), jnp.float32),
        "running_var":  0.5 + jax.random.uniform(keys[7], (C_OUT,), jnp.float32),
    }
    x = jax.random.normal(keys[8], (N, C_IN, L), jnp.float32)

    # Projection-residual branch, strides 1 and 2.
    for stride in (1, 2):
        fwd = functools.partial(hybrid_conv_block, kernel_size=KSIZE, stride=stride)
        out = jax.block_until_ready(fwd(x, params))
        ref = _reference(x, params, kernel_size=KSIZE, stride=stride)
        assert out.shape == ref.shape, (out.shape, ref.shape)
        # bf16 operands + tanh-GELU in the kernel vs exact-erf f32 reference.
        assert jnp.allclose(out, ref, atol=2e-2, rtol=2e-2), (
            "mismatch vs reference", stride, float(jnp.max(jnp.abs(out - ref))))

    # Identity-residual branch (in_c == out_c), stride 1.
    params_id = dict(params)
    params_id["w_main"] = 0.2 * jax.random.normal(
        keys[9], (C_IN, C_IN, KSIZE), jnp.float32)
    params_id["b_main"] = params["b_main"][:C_IN]
    params_id["gamma"] = params["gamma"][:C_IN]
    params_id["beta"] = params["beta"][:C_IN]
    params_id["running_mean"] = params["running_mean"][:C_IN]
    params_id["running_var"] = params["running_var"][:C_IN]
    params_id["w_res"] = None
    params_id["b_res"] = None
    out = jax.block_until_ready(
        hybrid_conv_block(x, params_id, kernel_size=KSIZE, stride=1))
    ref = _reference(x, params_id, kernel_size=KSIZE, stride=1)
    assert out.shape == ref.shape, (out.shape, ref.shape)
    assert jnp.allclose(out, ref, atol=2e-2, rtol=2e-2), (
        "identity-residual mismatch", float(jnp.max(jnp.abs(out - ref))))

    # TODO(synk): training-mode AddGatedNoise (random noise * sigmoid gate) and
    # batch-statistics BatchNorm are not reproduced; eval-mode semantics only.
    print("KERNEL_OK")
</pallas_src>

<mosaic_0001>
module attributes {stable_mosaic.version = 11 : i64} {
  func.func @_hybrid_kernel(%arg0: i32, %arg1: i32, %arg2: memref<1x16x130xbf16, #tpu.memory_space<vmem>>, %arg3: memref<4x8x16xbf16, #tpu.memory_space<vmem>>, %arg4: memref<8x2xf32, #tpu.memory_space<vmem>>, %arg5: memref<1x8x128xf32, #tpu.memory_space<vmem>>) attributes {dimension_semantics = [#tpu.dimension_semantics<parallel>, #tpu.dimension_semantics<parallel>], iteration_bounds = array<i64: 2, 1>, scalar_prefetch = 0 : i64, scratch_operands = 0 : i64, tpu.core_type = #tpu.core_type<tc>, window_params = [{transform_indices = @transform_0, window_bounds = array<i64: 1, 16, 130>}, {transform_indices = @transform_1, window_bounds = array<i64: 4, 8, 16>}, {transform_indices = @transform_2, window_bounds = array<i64: 8, 2>}, {transform_indices = @transform_3, window_bounds = array<i64: 1, 8, 128>}]} {
    %c0 = arith.constant 0 : index
    %c0_0 = arith.constant 0 : index
    %c0_1 = arith.constant 0 : index
    %0 = vector.load %arg3[%c0, %c0_0, %c0_1] : memref<4x8x16xbf16, #tpu.memory_space<vmem>>, vector<1x8x16xbf16>
    %1 = vector.shape_cast %0 : vector<1x8x16xbf16> to vector<8x16xbf16>
    %c0_2 = arith.constant 0 : index
    %c0_3 = arith.constant 0 : index
    %c0_4 = arith.constant 0 : index
    %2 = vector.load %arg2[%c0_2, %c0_3, %c0_4] : memref<1x16x130xbf16, #tpu.memory_space<vmem>>, vector<1x16x128xbf16>
    %3 = vector.shape_cast %2 : vector<1x16x128xbf16> to vector<16x128xbf16>
    %cst = arith.constant dense<0.000000e+00> : vector<8x128xf32>
    %4 = tpu.matmul %1, %3, %cst {dimension_numbers = #tpu.dot_dimension_numbers<[1], [0], [0], [1], [0, 0, 1, 1], [], []>} : vector<8x16xbf16>, vector<16x128xbf16>, vector<8x128xf32> -> vector<8x128xf32>
    %c1 = arith.constant 1 : index
    %c0_5 = arith.constant 0 : index
    %c0_6 = arith.constant 0 : index
    %5 = vector.load %arg3[%c1, %c0_5, %c0_6] : memref<4x8x16xbf16, #tpu.memory_space<vmem>>, vector<1x8x16xbf16>
    %6 = vector.shape_cast %5 : vector<1x8x16xbf16> to vector<8x16xbf16>
    %c0_7 = arith.constant 0 : index
    %c0_8 = arith.constant 0 : index
    %c1_9 = arith.constant 1 : index
    %7 = vector.load %arg2[%c0_7, %c0_8, %c1_9] : memref<1x16x130xbf16, #tpu.memory_space<vmem>>, vector<1x16x128xbf16>
    %8 = vector.shape_cast %7 : vector<1x16x128xbf16> to vector<16x128xbf16>
    %cst_10 = arith.constant dense<0.000000e+00> : vector<8x128xf32>
    %9 = tpu.matmul %6, %8, %cst_10 {dimension_numbers = #tpu.dot_dimension_numbers<[1], [0], [0], [1], [0, 0, 1, 1], [], []>} : vector<8x16xbf16>, vector<16x128xbf16>, vector<8x128xf32> -> vector<8x128xf32>
    %10 = arith.addf %4, %9 : vector<8x128xf32>
    %c2 = arith.constant 2 : index
    %c0_11 = arith.constant 0 : index
    %c0_12 = arith.constant 0 : index
    %11 = vector.load %arg3[%c2, %c0_11, %c0_12] : memref<4x8x16xbf16, #tpu.memory_space<vmem>>, vector<1x8x16xbf16>
    %12 = vector.shape_cast %11 : vector<1x8x16xbf16> to vector<8x16xbf16>
    %c0_13 = arith.constant 0 : index
    %c0_14 = arith.constant 0 : index
    %c2_15 = arith.constant 2 : index
    %13 = vector.load %arg2[%c0_13, %c0_14, %c2_15] : memref<1x16x130xbf16, #tpu.memory_space<vmem>>, vector<1x16x128xbf16>
    %14 = vector.shape_cast %13 : vector<1x16x128xbf16> to vector<16x128xbf16>
    %cst_16 = arith.constant dense<0.000000e+00> : vector<8x128xf32>
    %15 = tpu.matmul %12, %14, %cst_16 {dimension_numbers = #tpu.dot_dimension_numbers<[1], [0], [0], [1], [0, 0, 1, 1], [], []>} : vector<8x16xbf16>, vector<16x128xbf16>, vector<8x128xf32> -> vector<8x128xf32>
    %16 = arith.addf %10, %15 : vector<8x128xf32>
    %c0_17 = arith.constant 0 : index
    %c0_18 = arith.constant 0 : index
    %17 = vector.load %arg4[%c0_17, %c0_18] : memref<8x2xf32, #tpu.memory_space<vmem>>, vector<8x1xf32>
    %18 = vector.broadcast %17 : vector<8x1xf32> to vector<8x128xf32>
    %19 = arith.addf %16, %18 : vector<8x128xf32>
    %cst_19 = arith.constant 3.500000e-01 : f32
    %20 = vector.broadcast %cst_19 : f32 to vector<8x128xf32>
    %21 = arith.mulf %20, %19 : vector<8x128xf32>
    %cst_20 = arith.constant 4.471500e-02 : f32
    %22 = vector.broadcast %cst_20 : f32 to vector<8x128xf32>
    %23 = arith.mulf %22, %19 : vector<8x128xf32>
    %24 = arith.mulf %23, %19 : vector<8x128xf32>
    %25 = arith.mulf %24, %19 : vector<8x128xf32>
    %26 = arith.addf %19, %25 : vector<8x128xf32>
    %cst_21 = arith.constant 0.797884583 : f32
    %27 = vector.broadcast %cst_21 : f32 to vector<8x128xf32>
    %28 = arith.mulf %27, %26 : vector<8x128xf32>
    %29 = math.tanh %28 : vector<8x128xf32>
    %cst_22 = arith.constant 1.000000e+00 : f32
    %30 = vector.broadcast %cst_22 : f32 to vector<8x128xf32>
    %31 = arith.addf %30, %29 : vector<8x128xf32>
    %32 = arith.mulf %21, %31 : vector<8x128xf32>
    %c3 = arith.constant 3 : index
    %c0_23 = arith.constant 0 : index
    %c0_24 = arith.constant 0 : index
    %33 = vector.load %arg3[%c3, %c0_23, %c0_24] : memref<4x8x16xbf16, #tpu.memory_space<vmem>>, vector<1x8x16xbf16>
    %34 = vector.shape_cast %33 : vector<1x8x16xbf16> to vector<8x16xbf16>
    %c0_25 = arith.constant 0 : index
    %c0_26 = arith.constant 0 : index
    %c1_27 = arith.constant 1 : index
    %35 = vector.load %arg2[%c0_25, %c0_26, %c1_27] : memref<1x16x130xbf16, #tpu.memory_space<vmem>>, vector<1x16x128xbf16>
    %36 = vector.shape_cast %35 : vector<1x16x128xbf16> to vector<16x128xbf16>
    %cst_28 = arith.constant dense<0.000000e+00> : vector<8x128xf32>
    %37 = tpu.matmul %34, %36, %cst_28 {dimension_numbers = #tpu.dot_dimension_numbers<[1], [0], [0], [1], [0, 0, 1, 1], [], []>} : vector<8x16xbf16>, vector<16x128xbf16>, vector<8x128xf32> -> vector<8x128xf32>
    %38 = arith.addf %32, %37 : vector<8x128xf32>
    %c0_29 = arith.constant 0 : index
    %c1_30 = arith.constant 1 : index
    %39 = vector.load %arg4[%c0_29, %c1_30] : memref<8x2xf32, #tpu.memory_space<vmem>>, vector<8x1xf32>
    %40 = vector.broadcast %39 : vector<8x1xf32> to vector<8x128xf32>
    %41 = arith.addf %38, %40 : vector<8x128xf32>
    %c0_31 = arith.constant 0 : index
    %c0_32 = arith.constant 0 : index
    %c0_33 = arith.constant 0 : index
    %42 = vector.load %arg5[%c0_31, %c0_32, %c0_33] : memref<1x8x128xf32, #tpu.memory_space<vmem>>, vector<1x8x128xf32>
    %43 = vector.shape_cast %42 : vector<1x8x128xf32> to vector<8x128xf32>
    %44 = vector.shape_cast %41 : vector<8x128xf32> to vector<1x8x128xf32>
    tpu.vector_store %arg5[%c0_31, %c0_32, %c0_33], %44 {strides = array<i32>} : memref<1x8x128xf32, #tpu.memory_space<vmem>>, vector<1x8x128xf32>,
    return
  }
  func.func @transform_0(%arg0: i32, %arg1: i32) -> (i32, i32, i32) {
    %c0_i32 = arith.constant 0 : i32
    %c0_i32_0 = arith.constant 0 : i32
    %c0_i32_1 = arith.constant 0 : i32
    return %arg0, %c0_i32, %c0_i32_0 : i32, i32, i32
  }
  func.func @transform_1(%arg0: i32, %arg1: i32) -> (i32, i32, i32) {
    %c0_i32 = arith.constant 0 : i32
    %c0_i32_0 = arith.constant 0 : i32
    %c0_i32_1 = arith.constant 0 : i32
    return %c0_i32, %arg1, %c0_i32_0 : i32, i32, i32
  }
  func.func @transform_2(%arg0: i32, %arg1: i32) -> (i32, i32) {
    %c0_i32 = arith.constant 0 : i32
    %c0_i32_0 = arith.constant 0 : i32
    return %arg1, %c0_i32 : i32, i32
  }
  func.func @transform_3(%arg0: i32, %arg1: i32) -> (i32, i32, i32) {
    %c0_i32 = arith.constant 0 : i32
    %c0_i32_0 = arith.constant 0 : i32
    return %arg0, %arg1, %c0_i32 : i32, i32, i32
  }
}

</mosaic_0001>

<bundles_post_ra>
// kernel: tpu_custom_call.1
= control target key start
LH: loop header
LB: loop body
LE: loop exit
PB: predicated region body
PF: predicated region fallthrough
CT: control target
= control target key end

     0   :  { %8 = vsyncpa [#allocation3], 0  ;;  %s1101_s0 = inlined_call_operand.hbm [shape: bf16[2,16,130], index: 0, kind: input, shape index: {}]   ;;  %s1102_s1 = inlined_call_operand.hbm [shape: bf16[4,8,16], index: 1, kind: input, shape index: {}]   ;;  %s1103_s2 = inlined_call_operand.vmem [shape: f32[8,2], index: 2, kind: input, shape index: {}]   ;;  %s1104_s3 = inlined_call_operand.hbm [shape: f32[2,8,128], index: 3, kind: output, shape index: {}]  }
   0x1   :  { %10 = vsyncpa [#allocation3 + $0x1], 0 }
   0x2   :  { %11 = vsyncpa [#allocation6], 0 }
   0x3   :  { %12 = vsyncpa [#allocation4], 0 }
   0x4   :  { %14 = vsyncpa [#allocation4 + $0x1], 0  ;;  %s922_s12 = smov 0   ;;  %s924_s13 = smov 0  }
   0x5   :  { %s926_s14 = smov 0   ;;  %s928_s15 = smov 0  }
   0x6   :  { %s930_s16 = smov 0   ;;  %s932_s17 = smov 0  }
   0x7 LB: > { %s600_s18 = sadd.s32 4294967295, %s887_s17   ;;  %s601_s19 = sadd.s32 4294967294, %s887_s17   ;;  %s887_s17 = sphi %s932_s17, %s20_s17   ;;  %s883_s16 = sphi %s930_s16, %s1122_s16   ;;  %s879_s15 = sphi %s928_s15, %s1121_s15   ;;  %s875_s14 = sphi %s926_s14, %s1120_s14   ;;  %s871_s13 = sphi %s924_s13, %s1119_s13   ;;  %s867_s12 = sphi %s922_s12, %s1118_s12  }
   0x8   : > { %p52_p0 = scmp.ne.s32.totalorder %s871_s13, %s867_s12  ;;  %p956_p1 = scmp.eq.s32.totalorder %s600_s18, 0 }
   0x9   : > { %p960_p2 = scmp.eq.s32.totalorder %s600_s18, 1  ;;  %p136_p3 = scmp.eq.s32.totalorder %s601_s19, 1 }
   0xa   : > { %p966_p4 = por %p956_p1, %p52_p0  ;;  %p602_p5 = scmp.ge.s32.totalorder %s887_s17, 1 }
   0xb   : > { %p971_p6 = por %p136_p3, %p52_p0  ;;  %p143_p7 = scmp.lt.s32.totalorder %s887_s17, 3 }
   0xc   : > { %s1108_s22 = scalar_select %p966_p4, 1, 0 }
   0xd   : > { %s1109_s23 = scalar_select %p971_p6, 1, 0 }
   0xe   : > { %p976_p8 = pnand %p602_p5, %p143_p7  ;;  %s889_s25 = smov [#allocation5]  }
   0xf   : > { %s157_s26 = sshll.u32 %s889_s25, 4  ;;  %s32_s28 = sadd.s32 1, %s883_s16  ;;  %s158_s26 = int_to_ptr.vmem [resolvable:$true] %s157_s26 }
  0x10   : > { %p665_p9 = pneg %p976_p8  ;;  %s760_s29 = scalar_lea.vmem %s158_s26, 256 }
  0x11   : > { %p761_p13 = scmp.ne.s32.totalorder %s158_s26, %s760_s29  ;;  %p768_p5 = scmp.lt.s32.totalorder %s158_s26, %s158_s26 }
  0x12   : > { %p985_p11 = pnand %p665_p9, %p956_p1  ;;  %p769_p7 = scmp.lt.s32.totalorder %s760_s29, %s760_s29 }
  0x14   : > { %p751_p12 = pneg %p985_p11  ;;  %p770_p6 = por %p769_p7, %p768_p5 }
  0x16   : > { %p763_p0 = pnand %p761_p13, %p751_p12 }
  0x18   : > { %p764_p3 = pneg %p763_p0 }
  0x1a   : > { %p771_p4 = pnand %p770_p6, %p764_p3 }
  0x1c   : > { %774 = shalt.err (!%p771_p4)
}
  0x1d   : > { %s890_s30 = smov 64   ;;  %s891_s4 = smov 4  }
  0x1e   : > { %668 = dma.hbm_to_vmem [thread:$0]  (!%p985_p11), %s1102_s1, 256, %s158_s26, [#allocation6], %s890_s30, %s890_s30, %s891_s4  }
  0x1f   : > { %p34_p6 = scmp.ge.s32.totalorder %s32_s28, 2  ;;  %s39_s7 = sadd.s32 1, %s875_s14 }
  0x20   : > { %p46_p4 = scmp.ne.s32.totalorder %s875_s14, %s871_s13  ;;  %p47_p9 = scmp.eq.s32.totalorder %s887_s17, 0 }
  0x21   : > { %s1124_s28 = smov (%p34_p6, %s32_s28), 0  ;;  %p678_p0 = scmp.lt.s32.totalorder %s887_s17, 2 }
  0x22   : > { %p1003_p12 = por %p47_p9, %p46_p4  ;;  %p1009_p13 = por %p960_p2, %p46_p4 }
  0x23   : > { %s36_s10 = ssub.s32 %s883_s16, %s1124_s28  ;;  %s178_s11 = sand.u32 1, %s875_s14  }
  0x24   : > { %p37_p11 = scmp.eq.s32.totalorder %s36_s10, 0  ;;  %s606_s18 = sshll.u32 %s178_s11, 4 }
  0x25   : > { %s624_s25 = sshll.u32 %s883_s16, 8  ;;  %s182_s30 = scalar_lea.vmem [#allocation2], %s606_s18 }
  0x26   : > { %s1018_s19 = scalar_select %p37_p11, %s875_s14, %s39_s7  }
  0x27   : > { %s188_s29 = scalar_lea.hbm %s1101_s0, %s624_s25  ;;  %s189_s4 = sshll.u32 %s182_s30, 4  ;;  %s190_s4 = int_to_ptr.vmem [resolvable:$true] %s189_s4 }
  0x28   : > { %p1026_p2 = pnand %p678_p0, %p1003_p12  ;;  %s179_s5 = scalar_lea.sflag [#allocation3], %s178_s11 }
  0x29   : > { %s788_s6 = scalar_lea.vmem %s190_s4, 256  ;;  %s892_s7 = smov [#allocation2]  }
  0x2a   : > { %p777_p3 = pneg %p1026_p2  ;;  %p789_p5 = scmp.ne.s32.totalorder %s190_s4, %s788_s6 }
  0x2b   : > { %s793_s10 = sshll.u32 %s892_s7, 4  ;;  %s794_s10 = int_to_ptr.vmem [resolvable:$false] %s793_s10 }
  0x2c   : > { %p791_p7 = pnand %p789_p5, %p777_p3  ;;  %s795_s25 = scalar_lea.vmem %s794_s10, 512 }
  0x2d   : > { %p796_p4 = scmp.lt.s32.totalorder %s190_s4, %s794_s10  ;;  %p797_p9 = scmp.lt.s32.totalorder %s795_s25, %s788_s6 }
  0x2e   : > { %p792_p6 = pneg %p791_p7 }
  0x2f   : > { %p798_p11 = por %p797_p9, %p796_p4 }
  0x31   : > { %p799_p10 = pnand %p798_p11, %p792_p6 }
  0x33   : > { %802 = shalt.err (!%p799_p10)
}
  0x34   : > { %s893_s8 = smov 128   ;;  %s894_s18 = smov 8  }
  0x35   : > { %672 = dma.hbm_to_vmem [thread:$0]  (!%p1026_p2), %s188_s29, 256, %s190_s4, %s179_s5, %s893_s8, %s893_s8, %s894_s18  }
  0x36   : > { %201 = sbr.rel (%p976_p8) target bundleno = 438 (0x1b6), region = 32  ;;  %s1037_s11 = sand.u32 (!%p976_p8), 1, %s871_s13  }
  0x37   : > { %s610_s26 = sshll.u32 (!%p976_p8), %s1037_s11, 4  ;;  %s204_s27 = scalar_lea.sflag (!%p976_p8), [#allocation3], %s1037_s11 }
  0x38   : > { %s207_s30 = scalar_lea.vmem (!%p976_p8), [#allocation2], %s610_s26  ;;  %p1115_p12 = scmp.ne.s32.totalorder (!%p976_p8), %s1108_s22, 0 }
  0x3b   : > { %854 = dma.done.wait (%p1115_p12), %s204_s27, 256  }
  0x3c   : > { %856 = vsyncadd (%p1115_p12), %s204_s27, 4294967040 }
  0x3d   : > { %858 = dma.done.wait (%p956_p1), [#allocation6], 256  }
  0x3e   : > { %860 = vsyncadd (%p956_p1), [#allocation6], 4294967040  ;;  %v895_v0 = vmov 0.0   ;;  %vm896_vm0 = vmmov 0   ;;  %v743_v1 = vld [vmem:[%s207_s30] ss:$8 sps:$4 sm:$0xff]  }
  0x3f   : > { %639 = vmatprep.subr.bf16.mxu1 %v895_v0  ;;  %633 = vmatprep.subr.bf16.mxu0 %v895_v0  ;;  %v745_v2 = vld [vmem:[%s207_s30 + $0x4] ss:$8 sps:$4 sm:$0xff]   ;;  %s897_s24 = smov 126   ;;  %s898_s22 = smov 127   ;;  %v746_v3 = vld [vmem:[%s207_s30] ss:$8 sps:$4 sm:$0xff]  }
  0x40   : > { %641 = vmatprep.mubr.msk.bf16.mxu1 %vm896_vm0, %v895_v0  ;;  %635 = vmatprep.mubr.msk.bf16.mxu0 %vm896_vm0, %v895_v0  ;;  %v243_v4 = vld [vmem:[#allocation5] sm:$0xf]  ;;  %vm265_vm1 = vcmask 130048   ;;  %v899_v5 = vmov 0   ;;  %v900_v7 = vmov 1   ;;  %vm262_vm2 = vcmask 1039360  }
  0x41   : > { %360 = vrot.lane.b32.xlu1 %v743_v1, %s897_s24  ;;  %258 = vrot.lane.b32.xlu0 %v743_v1, %s898_s22  ;;  %v411_v6 = vld [vmem:[%s1103_s2] sm:$0xff]  ;;  %vm364_vm3 = vcmask 1031168   ;;  %v428_v14 = vld [vmem:[#allocation5 + $0xc] sm:$0xf]  ;;  %v359_v16 = vld [vmem:[#allocation5 + $0x8] sm:$0xf] }
  0x42   : > { %640 = vmatpush3.bf16.msra.mxu1 %v746_v3  ;;  %740 = vset.pattern.permute.xlu0 %v899_v5  ;;  %v247_v13 = vld [vmem:[#allocation5 + $0x4] sm:$0xf]  ;;  %s612_s4 = sshll.u32 %s1037_s11, 3  ;;  %s621_s21 = sshll.u32 %s879_s15, 7 }
  0x43   : > { %651 = vmatprep.subr.bf16.mxu1 %v895_v0  ;;  %741 = vset.pattern.permute.xlu1 %v900_v7  ;;  %s237_s5 = scalar_lea.vmem [#allocation7], %s612_s4  ;;  %s492_s25 = scalar_lea.hbm %s1104_s3, %s621_s21 }
  0x44   : > { %s494_s6 = sshll.u32 %s237_s5, 4  ;;  %s480_s8 = scalar_lea.sflag [#allocation4], %s1037_s11  ;;  %s495_s6 = int_to_ptr.vmem [resolvable:$true] %s494_s6 }
  0x45   : > { %362 = vrot.lane.b32.xlu1 %v745_v2, %s897_s24  ;;  %260 = vrot.lane.b32.xlu0 %v745_v2, %s898_s22  ;;  %s803_s18 = scalar_lea.vmem %s495_s6, 128  ;;  %s901_s26 = smov [#allocation7]  }
  0x46   : > { %642 = vmatmul.mubr.msk.bf16.vlgmr.msra.gmra.mxu1 %vm265_vm1, %v243_v4  ;;  %p804_p1 = scmp.ne.s32.totalorder %s495_s6, %s803_s18  ;;  %s807_s27 = sshll.u32 %s901_s26, 4  ;;  %s808_s27 = int_to_ptr.vmem [resolvable:$false] %s807_s27 }
  0x47   : > { %653 = vmatprep.mubr.msk.bf16.mxu1 %vm896_vm0, %v895_v0  ;;  %s809_s15 = scalar_lea.vmem %s808_s27, 256  ;;  %p810_p0 = scmp.lt.s32.totalorder %s495_s6, %s808_s27 }
  0x48   : > { %p805_p8 = pnand %p804_p1, %p1009_p13  ;;  %p811_p2 = scmp.lt.s32.totalorder %s809_s15, %s803_s18 }
  0x49   : > { %414 = vperm.xlu0 %740, %v411_v6   ;;  %474 = vperm.xlu1 %741, %v411_v6  }
  0x4a   : > { %p806_p10 = pneg %p805_p8  ;;  %p812_p3 = por %p811_p2, %p810_p0 }
  0x4c   : > { %p813_p5 = pnand %p812_p3, %p806_p10 }
  0x4d   : > { %742 = vset.pattern.permute.xlu0 %v900_v7 }
  0xb3   : > { %v361_v8 = vpop.permute.xlu1 %360  ;;  %v259_v9 = vpop.permute.xlu0 %258 }
  0xb7   : > { %v363_v10 = vpop.permute.xlu1 %362  ;;  %v261_v11 = vpop.permute.xlu0 %260 }
  0xb8   : > { %v263_v12 = vsel %vm262_vm2, %v259_v9, %v261_v11  ;;  %v365_v15 = vsel %vm364_vm3, %v361_v8, %v363_v10 }
  0xb9   : > { %634 = vmatpush3.bf16.msra.mxu0 %v263_v12  ;;  %652 = vmatpush3.bf16.msra.mxu1 %v263_v12 }
  0xba   : > { %645 = vmatprep.subr.bf16.mxu0 %v895_v0 }
  0xbc   : > { %636 = vmatmul.mubr.msk.bf16.vlgmr.msra.gmra.mxu0 %vm265_vm1, %v247_v13  ;;  %654 = vmatmul.mubr.msk.bf16.vlgmr.msra.gmra.mxu1 %vm265_vm1, %v428_v14 }
  0xbd   : > { %646 = vmatpush3.bf16.msra.mxu0 %v365_v15  ;;  %647 = vmatprep.mubr.msk.bf16.mxu0 %vm896_vm0, %v895_v0 }
  0xc4   : > { %648 = vmatmul.mubr.msk.bf16.vlgmr.msra.gmra.mxu0 %vm265_vm1, %v359_v16  ;;  %v415_v31 = vpop.permute.xlu0 %414  ;;  %v475_v46 = vpop.permute.xlu1 %474 }
 0x106   : > { %v352_v17 = vpop.f32.mrf.mxu1 }
 0x108   : > { %v643_v18 = vpop.f32.mrf.mxu1 }
 0x10a   : > { %v355_v19 = vpop.f32.mrf.mxu1 }
 0x10c   : > { %v644_v20 = vpop.f32.mrf.mxu1 }
 0x17c   : > { %v303_v21 = vpop.f32.mrf.mxu0  ;;  %v466_v22 = vpop.f32.mrf.mxu1 }
 0x17d   : > { %v353_v29 = vadd.f32 %v352_v17, %v303_v21 }
 0x17e   : > { %v637_v23 = vpop.f32.mrf.mxu0  ;;  %v655_v24 = vpop.f32.mrf.mxu1 }
 0x180   : > { %v306_v25 = vpop.f32.mrf.mxu0  ;;  %v469_v26 = vpop.f32.mrf.mxu1 }
 0x182   : > { %v638_v27 = vpop.f32.mrf.mxu0  ;;  %v656_v28 = vpop.f32.mrf.mxu1 }
 0x184   : > { %v404_v30 = vpop.f32.mrf.mxu0 }
 0x185   : > { %v410_v32 = vadd.f32 %v404_v30, %v353_v29 }
 0x186   : > { %v649_v33 = vpop.f32.mrf.mxu0 }
 0x187   : > { %v417_v34 = vadd.f32 %v415_v31, %v410_v32 }
 0x188   : > { %v407_v35 = vpop.f32.mrf.mxu0 }
 0x189   : > { %v419_v36 = vmul.f32 0.044715, %v417_v34  ;;  %v418_v43 = vmul.f32 0.35, %v417_v34 }
 0x18a   : > { %v650_v37 = vpop.f32.mrf.mxu0 }
 0x18b   : > { %v420_v38 = vmul.f32 %v419_v36, %v417_v34 }
 0x18d   : > { %v421_v39 = vmul.f32 %v420_v38, %v417_v34 }
 0x18f   : > { %v422_v40 = vadd.f32 %v421_v39, %v417_v34 }
 0x191   : > { %v423_v41 = vmul.f32 0.7978846, %v422_v40 }
 0x193   : > { %747 = vtanh.f32 %v423_v41 }
 0x1a0   : > { %v748_v42 = vpop.eup %747 }
 0x1a1   : > { %v425_v44 = vadd.f32 1.0, %v748_v42 }
 0x1a3   : > { %v426_v45 = vmul.f32 %v425_v44, %v418_v43 }
 0x1a5   : > { %v472_v47 = vadd.f32 %v466_v22, %v426_v45 }
 0x1a7   : > { %v477_v48 = vadd.f32 %v475_v46, %v472_v47 }
 0x1a9   : > { %478 = vst [vmem:[%s237_s5] sm:$0xff] %v477_v48 }
 0x1aa   : > { %816 = shalt.err (!%p813_p5)
}
 0x1ab   : > { %s817_s30 = scalar_lea.hbm %s492_s25, 128  ;;  %s821_s22 = scalar_lea.hbm %s1104_s3, 256 }
 0x1ac   : > { %p818_p7 = scmp.ne.s32.totalorder %s492_s25, %s817_s30  ;;  %p822_p9 = scmp.lt.s32.totalorder %s492_s25, %s1104_s3 }
 0x1ad   : > { %p823_p11 = scmp.lt.s32.totalorder %s821_s22, %s817_s30 }
 0x1ae   : > { %p819_p6 = pnand %p818_p7, %p1009_p13 }
 0x1af   : > { %p824_p12 = por %p823_p11, %p822_p9 }
 0x1b0   : > { %p820_p4 = pneg %p819_p6 }
 0x1b2   : > { %p825_p1 = pnand %p824_p12, %p820_p4 }
 0x1b4   : > { %828 = shalt.err (!%p825_p1)
}
 0x1b5   : > { %663 = dma.vmem_to_hbm [thread:$0]  (%p1009_p13), %s495_s6, 128, %s492_s25, %s480_s8  }
 0x1b6 PF: > { %s506_s4 = sand.u32 1, %s867_s12   ;;  %p1116_p8 = scmp.ne.s32.totalorder %s1109_s23, 0 }
 0x1b7   : > { %p1117_p10 = scmp.ge.s32.totalorder %s887_s17, 2  ;;  %s507_s21 = scalar_lea.sflag [#allocation4], %s506_s4 }
 0x1b9   : > { %p674_p0 = pnand %p1117_p10, %p1116_p8 }
 0x1bb   : > { %p675_p2 = pneg %p674_p0 }
 0x1bd   : > { %862 = dma.done.wait (%p675_p2), %s507_s21, 128  }
 0x1be   : > { %864 = vsyncadd (%p675_p2), %s507_s21, 4294967168  ;;  %s20_s17 = sadd.s32 1, %s887_s17   ;;  %s1118_s12 = smov %s871_s13 }
 0x1bf   : > { %p17_p3 = scmp.ge.s32.totalorder %s20_s17, 4   ;;  %s1119_s13 = smov %s875_s14 }
 0x1c0   : > { %s1120_s14 = smov %s1018_s19  ;;  %s1121_s15 = smov %s883_s16 }
 0x1c1   : > { %s1122_s16 = smov %s1124_s28  ;;  %19 = sbr.rel (!%p17_p3) target bundleno = 7 (0x7), region = 88 }
 0x1c6   :  { %512 = vsyncpa [#allocation3], 1 }
 0x1c7   :  { %514 = vsyncpa [#allocation3 + $0x1], 1 }
 0x1c8   :  { %515 = vsyncpa [#allocation6], 1 }
 0x1c9   :  { %516 = vsyncpa [#allocation4], 1 }
 0x1ca   :  { %518 = vsyncpa [#allocation4 + $0x1], 1 }

</bundles_post_ra>
